<compile_context>
chip_gen: v7x
topology: tpu7x:2x2x1
jax: 0.10.0
libtpu: 0.0.40
codegen_flags: <defaults>
</compile_context>

<pallas_src>
import math

import jax
import jax.numpy as jnp
from jax.experimental import pallas as pl
from jax.experimental.pallas import tpu as pltpu

D_K = 8
_INV_SQRT_DK = 1.0 / math.sqrt(D_K)
_MASK_FILL = -1e-09  # faithful to the PyTorch module: masked_fill_(mask, -1e-09)

_SUBLANE_MIN = {4: 8, 2: 16, 1: 32}  # per-dtype second-to-last-dim tiling minimum


# --------------------------------------------------------------------------- #
# Kernels
# --------------------------------------------------------------------------- #
def _sdpa_kernel_single(q_ref, kT_ref, v_ref, mask_ref, o_ref):
    """Whole-Sk tile: plain softmax, no scratch, no online-softmax rescale.

    Block shapes:
      q_ref    (T, tq, Dk)
      kT_ref   (T, Dk, Sk)     -- K pre-transposed, lane-dense
      v_ref    (T, Sk, Dv)
      mask_ref (T or 1, tq, Sk) int8 (nonzero == masked)
      o_ref    (T, tq, Dv)
    """
    q = q_ref[...] * _INV_SQRT_DK  # fold 1/sqrt(d_k) into q: O(S*D) not O(S^2)
    s = jnp.einsum("bqd,bdk->bqk", q, kT_ref[...],
                   preferred_element_type=jnp.float32)
    # torch masked_fill_(mask, -1e-09): REPLACE the score where the mask is set.
    s = jnp.where(mask_ref[...] != 0, jnp.float32(_MASK_FILL), s)
    m = s.max(axis=-1, keepdims=True)
    p = jnp.exp(s - m)
    denom = p.sum(axis=-1, keepdims=True)
    o = jnp.einsum("bqk,bkd->bqd", p.astype(v_ref.dtype), v_ref[...],
                   preferred_element_type=jnp.float32)
    o_ref[...] = (o * pl.reciprocal(denom, approx=False)).astype(o_ref.dtype)


def _sdpa_kernel_flash(q_ref, kT_ref, v_ref, mask_ref, o_ref, m_sc, l_sc, acc_sc):
    """Flash-style online softmax across kv tiles (kv is the innermost grid axis).

    Block shapes:
      q_ref    (T, tq, Dk)
      kT_ref   (T, Dk, tk)
      v_ref    (T, tk, Dv)
      mask_ref (T or 1, tq, tk) int8
      o_ref    (T, tq, Dv)   -- resident across the kv grid axis
      m_sc/l_sc (T, tq, 1) f32 scratch (lane-padded to 128; accounted in budget)
      acc_sc   (T, tq, Dv) f32 scratch
    """
    kv_step = pl.program_id(2)

    @pl.when(kv_step == 0)
    def _init():
        m_sc[...] = jnp.full(m_sc.shape, -jnp.inf, dtype=m_sc.dtype)
        l_sc[...] = jnp.zeros(l_sc.shape, dtype=l_sc.dtype)
        acc_sc[...] = jnp.zeros(acc_sc.shape, dtype=acc_sc.dtype)

    q = q_ref[...] * _INV_SQRT_DK
    s = jnp.einsum("bqd,bdk->bqk", q, kT_ref[...],
                   preferred_element_type=jnp.float32)
    s = jnp.where(mask_ref[...] != 0, jnp.float32(_MASK_FILL), s)

    m_prev = m_sc[...]
    m_new = jnp.maximum(m_prev, s.max(axis=-1, keepdims=True))
    alpha = jnp.exp(m_prev - m_new)
    p = jnp.exp(s - m_new)
    l_sc[...] = alpha * l_sc[...] + p.sum(axis=-1, keepdims=True)
    acc_sc[...] = alpha * acc_sc[...] + jnp.einsum(
        "bqk,bkd->bqd", p.astype(v_ref.dtype), v_ref[...],
        preferred_element_type=jnp.float32)
    m_sc[...] = m_new

    @pl.when(kv_step == pl.num_programs(2) - 1)
    def _finalize():
        # Full-precision reciprocal preserves the module's f32 numerics
        # (approx=True is a free EUP win if ~1e-3 error is acceptable).
        o_ref[...] = (acc_sc[...] * pl.reciprocal(l_sc[...], approx=False)
                      ).astype(o_ref.dtype)


# --------------------------------------------------------------------------- #
# Tiling / VMEM-budget helpers
# --------------------------------------------------------------------------- #
def _round_up(x, m):
    return ((x + m - 1) // m) * m


def _largest_divisor_leq(n, cap):
    cap = max(1, min(cap, n))
    t = cap
    while n % t:
        t -= 1
    return t


def _pick_seq_tile(n, cap, align, axis_name):
    """Full extent if it fits, otherwise the largest `align`-aligned divisor."""
    if n <= cap:
        return n
    t = (cap // align) * align
    while t >= align and n % t:
        t -= align
    if t < align:
        # TODO(synk): pad the sequence (masking the tail) instead of raising.
        raise ValueError(
            f"{axis_name}={n} has no {align}-aligned tile <= {cap}; "
            f"pad the sequence or adjust q_tile/kv_tile.")
    return t


def _padded_vmem_bytes(shape, dtype):
    """Bytes a VMEM buffer of `shape` occupies after (sublane, lane) padding."""
    dt = jnp.dtype(dtype)
    sub_min = _SUBLANE_MIN.get(dt.itemsize, 8)
    lead = 1
    for d in shape[:-2]:
        lead *= d
    sub = _round_up(shape[-2], sub_min)
    lane = _round_up(shape[-1], 128)
    return lead * sub * lane * dt.itemsize


def _vmem_capacity_bytes():
    try:
        info = pltpu.get_tpu_info()
        return int(getattr(info, "vmem_capacity_bytes", 64 << 20))
    except Exception:
        return 64 << 20  # conservative: v7x per-TensorCore VMEM


def _vmem_bytes_estimate(T, tq, tk, Dk, Dv, in_dtype, out_dtype, mask_T, flash):
    dbl = 2  # BlockSpec double buffering per input/output
    b = dbl * (_padded_vmem_bytes((T, tq, Dk), in_dtype)        # q
               + _padded_vmem_bytes((T, Dk, tk), in_dtype)      # K^T (lane-dense)
               + _padded_vmem_bytes((T, tk, Dv), in_dtype)      # v
               + _padded_vmem_bytes((mask_T, tq, tk), jnp.int8)  # mask
               + _padded_vmem_bytes((T, tq, Dv), out_dtype))    # out
    if flash:
        b += 2 * _padded_vmem_bytes((T, tq, 1), jnp.float32)    # m, l (lane-padded)
        b += _padded_vmem_bytes((T, tq, Dv), jnp.float32)       # acc
    # f32 score / prob temporaries that spill from vregs into VMEM scratch.
    b += 2 * _padded_vmem_bytes((T, tq, tk), jnp.float32)
    return b


# --------------------------------------------------------------------------- #
# Wrapper
# --------------------------------------------------------------------------- #
def scaled_dot_product(q_s, k_s, v_s, mask, *,
                       head_block=8, q_tile=256, kv_tile=512,
                       compute_dtype=None):
    """q_s, k_s, v_s: [B, H, S, D]; mask: bool, broadcastable to [B, H, Sq, Sk]
    (True == masked, i.e. replaced by -1e-09 before softmax, as in the module)."""
    B, H, Sq, Dk = q_s.shape
    Sk = k_s.shape[2]
    Dv = v_s.shape[3]
    BH = B * H
    out_dtype = q_s.dtype

    if compute_dtype is not None:
        # NOTE: bf16 helps MXU/EUP on v6e/v7x only; on v5e (no bf16 VPU/EUP) the
        # casts cost VALU slots, and it will not meet a 1e-5 tolerance anywhere.
        q_s = q_s.astype(compute_dtype)
        k_s = k_s.astype(compute_dtype)
        v_s = v_s.astype(compute_dtype)

    q2 = q_s.reshape(BH, Sq, Dk)
    kT = jnp.swapaxes(k_s.reshape(BH, Sk, Dk), -1, -2)   # (BH, Dk, Sk) lane-dense K
    v2 = v_s.reshape(BH, Sk, Dv)

    # Mask: the dominant HBM stream.  If it is broadcast over heads do NOT
    # materialise BH copies -- keep it [B, Sq, Sk] and map head-blocks -> batch.
    if mask.ndim != 4:
        raise ValueError("mask must be 4-D and broadcastable to (B, H, Sq, Sk)")
    broadcast_head = (mask.shape[1] == 1)
    if broadcast_head:
        m2 = jnp.broadcast_to(mask, (B, 1, Sq, Sk)).astype(jnp.int8).reshape(B, Sq, Sk)
    else:
        m2 = jnp.broadcast_to(mask, (B, H, Sq, Sk)).astype(jnp.int8).reshape(BH, Sq, Sk)
    # TODO(synk): bit-pack the mask 8:1 and unpack with in-kernel compares to cut
    # the dominant HBM stream further on v5e/v6e (VPU has slack).

    # Head-block: for the broadcast-mask path keep each block inside one batch
    # (T | H) so the mask block is a single (1, tq, tk) slice.
    T = _largest_divisor_leq(H if broadcast_head else BH, head_block)
    mask_T = 1 if broadcast_head else T

    tq = _pick_seq_tile(Sq, q_tile, 32, "Sq")    # 32 = int8-mask sublane minimum
    tk = _pick_seq_tile(Sk, kv_tile, 128, "Sk")  # 128 = lane minimum
    n_kv = Sk // tk
    grid_bh = BH // T

    # Explicit VMEM budget -> vmem_limit_bytes (defaults fit v7x 64 MiB / v5e).
    est = _vmem_bytes_estimate(T, tq, tk, Dk, Dv, q2.dtype, out_dtype,
                               mask_T, flash=(n_kv > 1))
    cap = _vmem_capacity_bytes()
    vmem_limit = int(min(max(est + (8 << 20), 32 << 20), cap - (4 << 20)))

    if broadcast_head:
        blocks_per_batch = H // T  # >= 1 since T | H
        mask_map_2 = lambda i, qj: (i // blocks_per_batch, qj, 0)
        mask_map_3 = lambda i, qj, kj: (i // blocks_per_batch, qj, kj)
    else:
        mask_map_2 = lambda i, qj: (i, qj, 0)
        mask_map_3 = lambda i, qj, kj: (i, qj, kj)

    if n_kv == 1:
        # Single kv-tile specialization: no scratch, no online-softmax rescale.
        kernel = _sdpa_kernel_single
        grid = (grid_bh, Sq // tq)
        in_specs = [
            pl.BlockSpec((T, tq, Dk), lambda i, qj: (i, qj, 0)),
            pl.BlockSpec((T, Dk, Sk), lambda i, qj: (i, 0, 0)),
            pl.BlockSpec((T, Sk, Dv), lambda i, qj: (i, 0, 0)),
            pl.BlockSpec((mask_T, tq, Sk), mask_map_2),
        ]
        out_specs = pl.BlockSpec((T, tq, Dv), lambda i, qj: (i, qj, 0))
        scratch_shapes = ()
        dim_sem = ("parallel", "parallel")
    else:
        kernel = _sdpa_kernel_flash
        grid = (grid_bh, Sq // tq, n_kv)          # kv reduction axis innermost
        in_specs = [
            pl.BlockSpec((T, tq, Dk), lambda i, qj, kj: (i, qj, 0)),
            pl.BlockSpec((T, Dk, tk), lambda i, qj, kj: (i, 0, kj)),
            pl.BlockSpec((T, tk, Dv), lambda i, qj, kj: (i, kj, 0)),
            pl.BlockSpec((mask_T, tq, tk), mask_map_3),
        ]
        out_specs = pl.BlockSpec((T, tq, Dv), lambda i, qj, kj: (i, qj, 0))
        scratch_shapes = (
            pltpu.VMEM((T, tq, 1), jnp.float32),   # running max
            pltpu.VMEM((T, tq, 1), jnp.float32),   # running denom
            pltpu.VMEM((T, tq, Dv), jnp.float32),  # output accumulator
        )
        dim_sem = ("parallel", "parallel", "arbitrary")

    # TODO(synk): with this module's d_k = 8 the score/output lane width is only
    # 8 of 128 lanes; a fully lane-dense output layout needs head dim >= 128.

    out = pl.pallas_call(
        kernel,
        out_shape=jax.ShapeDtypeStruct((BH, Sq, Dv), out_dtype),
        grid_spec=pltpu.PrefetchScalarGridSpec(
            num_scalar_prefetch=0,
            grid=grid,
            in_specs=in_specs,
            out_specs=out_specs,
            scratch_shapes=scratch_shapes,
        ),
        compiler_params=pltpu.CompilerParams(
            dimension_semantics=dim_sem,
            vmem_limit_bytes=vmem_limit),
    )(q2, kT, v2, m2)

    return out.reshape(B, H, Sq, Dv)


# --------------------------------------------------------------------------- #
# Reference + self-test
# --------------------------------------------------------------------------- #
def _reference(q_s, k_s, v_s, mask):
    scores = jnp.matmul(q_s, jnp.swapaxes(k_s, -1, -2)) / math.sqrt(D_K)
    scores = jnp.where(mask, _MASK_FILL, scores)
    probs = jax.nn.softmax(scores, axis=-1)
    return jnp.matmul(probs, v_s)


if __name__ == "__main__":
    key = jax.random.PRNGKey(0)
    kq, kk, kvk, km = jax.random.split(key, 4)

    # --- Test 1: module-faithful small shapes (B=2, H=2, S=8, d_k=8), per-head mask.
    B, H, S = 2, 2, 8
    q_s = jax.random.normal(kq, (B, H, S, D_K), dtype=jnp.float32)
    k_s = jax.random.normal(kk, (B, H, S, D_K), dtype=jnp.float32)
    v_s = jax.random.normal(kvk, (B, H, S, D_K), dtype=jnp.float32)
    mask = jax.random.bernoulli(km, p=0.3, shape=(B, H, S, S))

    out = scaled_dot_product(q_s, k_s, v_s, mask)
    jax.block_until_ready(out)
    ref = _reference(q_s, k_s, v_s, mask)
    assert out.shape == (B, H, S, D_K)
    assert jnp.allclose(out, ref, atol=1e-5, rtol=1e-5), \
        "mismatch vs JAX reference (single-kv-tile path)"

    # --- Test 2: exercise the flash (multi-kv-tile) path and the head-broadcast
    #     mask path at a longer sequence with small tiles.
    k1, k2_, k3, k4 = jax.random.split(jax.random.PRNGKey(0), 4)
    S2 = 256
    q_l = jax.random.normal(k1, (B, H, S2, D_K), dtype=jnp.float32)
    k_l = jax.random.normal(k2_, (B, H, S2, D_K), dtype=jnp.float32)
    v_l = jax.random.normal(k3, (B, H, S2, D_K), dtype=jnp.float32)
    mask_l = jax.random.bernoulli(k4, p=0.3, shape=(B, 1, S2, S2))  # head-broadcast

    out_l = scaled_dot_product(q_l, k_l, v_l, mask_l,
                               head_block=8, q_tile=128, kv_tile=128)
    jax.block_until_ready(out_l)
    ref_l = _reference(q_l, k_l, v_l, mask_l)
    assert out_l.shape == (B, H, S2, D_K)
    assert jnp.allclose(out_l, ref_l, atol=1e-3, rtol=1e-3), \
        "mismatch vs JAX reference (flash / broadcast-mask path)"

    print("KERNEL_OK")
</pallas_src>

<mosaic_0001>
module attributes {stable_mosaic.version = 11 : i64} {
  func.func @_sdpa_kernel_single(%arg0: i32, %arg1: i32, %arg2: memref<4x8x8xf32, #tpu.memory_space<vmem>>, %arg3: memref<4x8x8xf32, #tpu.memory_space<vmem>>, %arg4: memref<4x8x8xf32, #tpu.memory_space<vmem>>, %arg5: memref<4x8x8xi8, #tpu.memory_space<vmem>>, %arg6: memref<4x8x8xf32, #tpu.memory_space<vmem>>) attributes {dimension_semantics = [#tpu.dimension_semantics<parallel>, #tpu.dimension_semantics<parallel>], iteration_bounds = array<i64: 1, 1>, scalar_prefetch = 0 : i64, scratch_operands = 0 : i64, tpu.core_type = #tpu.core_type<tc>, window_params = [{transform_indices = @transform_0, window_bounds = array<i64: 4, 8, 8>}, {transform_indices = @transform_1, window_bounds = array<i64: 4, 8, 8>}, {transform_indices = @transform_2, window_bounds = array<i64: 4, 8, 8>}, {transform_indices = @transform_3, window_bounds = array<i64: 4, 8, 8>}, {transform_indices = @transform_4, window_bounds = array<i64: 4, 8, 8>}]} {
    %c0 = arith.constant 0 : index
    %c0_0 = arith.constant 0 : index
    %c0_1 = arith.constant 0 : index
    %0 = vector.load %arg2[%c0, %c0_0, %c0_1] : memref<4x8x8xf32, #tpu.memory_space<vmem>>, vector<4x8x8xf32>
    %cst = arith.constant 0.353553385 : f32
    %1 = vector.broadcast %cst : f32 to vector<4x8x8xf32>
    %2 = arith.mulf %0, %1 : vector<4x8x8xf32>
    %c0_2 = arith.constant 0 : index
    %c0_3 = arith.constant 0 : index
    %c0_4 = arith.constant 0 : index
    %3 = vector.load %arg3[%c0_2, %c0_3, %c0_4] : memref<4x8x8xf32, #tpu.memory_space<vmem>>, vector<4x8x8xf32>
    "tpu.trace_start"() <{level = 10 : i32, message = "bqd,bdk->bqk"}> : () -> ()
    %cst_5 = arith.constant dense<0.000000e+00> : vector<4x8x8xf32>
    %4 = tpu.matmul %2, %3, %cst_5 {dimension_numbers = #tpu.dot_dimension_numbers<[2], [1], [1], [2], [0, 0, 0, 1, 1, 2], [0], [0]>} : vector<4x8x8xf32>, vector<4x8x8xf32>, vector<4x8x8xf32> -> vector<4x8x8xf32>
    "tpu.trace_stop"() : () -> ()
    %c0_6 = arith.constant 0 : index
    %c0_7 = arith.constant 0 : index
    %c0_8 = arith.constant 0 : index
    %5 = vector.load %arg5[%c0_6, %c0_7, %c0_8] : memref<4x8x8xi8, #tpu.memory_space<vmem>>, vector<4x8x8xi8>
    %c0_i8 = arith.constant 0 : i8
    %6 = vector.broadcast %c0_i8 : i8 to vector<4x8x8xi8>
    %7 = arith.cmpi ne, %5, %6 : vector<4x8x8xi8>
    %cst_9 = arith.constant -9.99999971E-10 : f32
    %8 = vector.broadcast %cst_9 : f32 to vector<4x8x8xf32>
    %9 = arith.select %7, %8, %4 : vector<4x8x8xi1>, vector<4x8x8xf32>
    %cst_10 = arith.constant dense<0xFF800000> : vector<4x8xf32>
    %10 = vector.multi_reduction <maximumf>, %9, %cst_10 [2] : vector<4x8x8xf32> to vector<4x8xf32>
    %11 = vector.shape_cast %10 : vector<4x8xf32> to vector<4x8x1xf32>
    %12 = vector.broadcast %11 : vector<4x8x1xf32> to vector<4x8x8xf32>
    %13 = arith.subf %9, %12 : vector<4x8x8xf32>
    %14 = math.exp %13 : vector<4x8x8xf32>
    %cst_11 = arith.constant dense<0.000000e+00> : vector<4x8xf32>
    %15 = vector.multi_reduction <add>, %14, %cst_11 [2] : vector<4x8x8xf32> to vector<4x8xf32>
    %16 = vector.shape_cast %15 : vector<4x8xf32> to vector<4x8x1xf32>
    %c0_12 = arith.constant 0 : index
    %c0_13 = arith.constant 0 : index
    %c0_14 = arith.constant 0 : index
    %17 = vector.load %arg4[%c0_12, %c0_13, %c0_14] : memref<4x8x8xf32, #tpu.memory_space<vmem>>, vector<4x8x8xf32>
    "tpu.trace_start"() <{level = 10 : i32, message = "bqk,bkd->bqd"}> : () -> ()
    %cst_15 = arith.constant dense<0.000000e+00> : vector<4x8x8xf32>
    %18 = tpu.matmul %14, %17, %cst_15 {dimension_numbers = #tpu.dot_dimension_numbers<[2], [1], [1], [2], [0, 0, 0, 1, 1, 2], [0], [0]>} : vector<4x8x8xf32>, vector<4x8x8xf32>, vector<4x8x8xf32> -> vector<4x8x8xf32>
    "tpu.trace_stop"() : () -> ()
    %19 = tpu.reciprocal %16 : vector<4x8x1xf32> -> vector<4x8x1xf32>
    %20 = vector.broadcast %19 : vector<4x8x1xf32> to vector<4x8x8xf32>
    %21 = arith.mulf %18, %20 : vector<4x8x8xf32>
    %c0_16 = arith.constant 0 : index
    %c0_17 = arith.constant 0 : index
    %c0_18 = arith.constant 0 : index
    %22 = vector.load %arg6[%c0_16, %c0_17, %c0_18] : memref<4x8x8xf32, #tpu.memory_space<vmem>>, vector<4x8x8xf32>
    tpu.vector_store %arg6[%c0_16, %c0_17, %c0_18], %21 {strides = array<i32>} : memref<4x8x8xf32, #tpu.memory_space<vmem>>, vector<4x8x8xf32>,
    return
  }
  func.func @transform_0(%arg0: i32, %arg1: i32) -> (i32, i32, i32) {
    %c0_i32 = arith.constant 0 : i32
    %c0_i32_0 = arith.constant 0 : i32
    return %arg0, %arg1, %c0_i32 : i32, i32, i32
  }
  func.func @transform_1(%arg0: i32, %arg1: i32) -> (i32, i32, i32) {
    %c0_i32 = arith.constant 0 : i32
    %c0_i32_0 = arith.constant 0 : i32
    %c0_i32_1 = arith.constant 0 : i32
    return %arg0, %c0_i32, %c0_i32_0 : i32, i32, i32
  }
  func.func @transform_2(%arg0: i32, %arg1: i32) -> (i32, i32, i32) {
    %c0_i32 = arith.constant 0 : i32
    %c0_i32_0 = arith.constant 0 : i32
    %c0_i32_1 = arith.constant 0 : i32
    return %arg0, %c0_i32, %c0_i32_0 : i32, i32, i32
  }
  func.func @transform_3(%arg0: i32, %arg1: i32) -> (i32, i32, i32) {
    %c0_i32 = arith.constant 0 : i32
    %c0_i32_0 = arith.constant 0 : i32
    return %arg0, %arg1, %c0_i32 : i32, i32, i32
  }
  func.func @transform_4(%arg0: i32, %arg1: i32) -> (i32, i32, i32) {
    %c0_i32 = arith.constant 0 : i32
    %c0_i32_0 = arith.constant 0 : i32
    return %arg0, %arg1, %c0_i32 : i32, i32, i32
  }
}

</mosaic_0001>

<bundles_post_ra>
// kernel: tpu_custom_call.1
= control target key start
LH: loop header
LB: loop body
LE: loop exit
PB: predicated region body
PF: predicated region fallthrough
CT: control target
= control target key end

     0   :  { %9 = vsyncpa [#allocation3], 0  ;;  %s1092_s0 = inlined_call_operand.hbm [shape: f32[4,8,8], index: 0, kind: input, shape index: {}]   ;;  %s1093_s1 = inlined_call_operand.hbm [shape: f32[4,8,8], index: 1, kind: input, shape index: {}]   ;;  %s1094_s2 = inlined_call_operand.hbm [shape: f32[4,8,8], index: 2, kind: input, shape index: {}]   ;;  %s1095_s3 = inlined_call_operand.vmem [shape: s8[4,8,8], index: 3, kind: input, shape index: {}]   ;;  %s1096_s4 = inlined_call_operand.hbm [shape: f32[4,8,8], index: 4, kind: output, shape index: {}]  }
   0x1   :  { %10 = vsyncpa [#allocation6], 0 }
   0x2   :  { %11 = vsyncpa [#allocation4], 0  ;;  %s935_s15 = smov [#allocation5]   ;;  %s936_s17 = smov [#allocation2]  }
   0x3   :  { %s29_s16 = sshll.u32 %s935_s15, 4  ;;  %s17_s18 = sshll.u32 %s936_s17, 4  ;;  %s30_s16 = int_to_ptr.vmem [resolvable:$true] %s29_s16  ;;  %s969_s18 = int_to_ptr.vmem [resolvable:$true] %s17_s18 }
   0x4   :  { %s841_s21 = scalar_lea.hbm %s1093_s1, 512 }
   0x5   :  { %p842_p0 = scmp.ne.s32.totalorder %s1093_s1, %s841_s21  ;;  %p845_p1 = scmp.lt.u32.totalorder %s841_s21, %s1093_s1 }
   0x7   :  { %p847_p2 = pnand %p845_p1, %p842_p0 }
   0x9   :  { %850 = shalt.err (!%p847_p2)
}
   0xa   :  { %s851_s26 = scalar_lea.vmem %s30_s16, 512  ;;  %p856_p4 = scmp.lt.s32.totalorder %s30_s16, %s30_s16 }
   0xb   :  { %p852_p3 = scmp.ne.s32.totalorder %s30_s16, %s851_s26  ;;  %p857_p5 = scmp.lt.s32.totalorder %s851_s26, %s851_s26 }
   0xd   :  { %p858_p6 = por %p857_p5, %p856_p4 }
   0xf   :  { %p859_p7 = pnand %p858_p6, %p852_p3 }
  0x11   :  { %862 = shalt.err (!%p859_p7)
}
  0x12   :  { %s937_s27 = smov 128   ;;  %s938_s28 = smov 8  }
  0x13   :  { %35 = dma.hbm_to_vmem [thread:$0]  %s1093_s1, 512, %s30_s16, [#allocation6], %s937_s27, %s937_s27, %s938_s28  }
  0x14   :  { %s863_s7 = scalar_lea.hbm %s1092_s0, 512 }
  0x15   :  { %p864_p8 = scmp.ne.s32.totalorder %s1092_s0, %s863_s7  ;;  %p867_p9 = scmp.lt.u32.totalorder %s863_s7, %s1092_s0 }
  0x17   :  { %p869_p10 = pnand %p867_p9, %p864_p8 }
  0x19   :  { %872 = shalt.err (!%p869_p10)
}
  0x1a   :  { %s873_s12 = scalar_lea.vmem %s969_s18, 512  ;;  %p878_p12 = scmp.lt.s32.totalorder %s969_s18, %s969_s18 }
  0x1b   :  { %p874_p11 = scmp.ne.s32.totalorder %s969_s18, %s873_s12  ;;  %p879_p13 = scmp.lt.s32.totalorder %s873_s12, %s873_s12 }
  0x1d   :  { %p880_p0 = por %p879_p13, %p878_p12 }
  0x1f   :  { %p881_p1 = pnand %p880_p0, %p874_p11 }
  0x21   :  { %884 = shalt.err (!%p881_p1)
}
  0x22   :  { %23 = dma.hbm_to_vmem [thread:$0]  %s1092_s0, 512, %s969_s18, [#allocation3], %s937_s27, %s937_s27, %s938_s28  }
  0x23   :  { %s939_s14 = smov [#allocation7]   ;;  %s885_s19 = scalar_lea.hbm %s1094_s2, 512 }
  0x24   :  { %s41_s15 = sshll.u32 %s939_s14, 4  ;;  %p886_p2 = scmp.ne.s32.totalorder %s1094_s2, %s885_s19  ;;  %s42_s15 = int_to_ptr.vmem [resolvable:$true] %s41_s15 }
  0x25   :  { %p889_p3 = scmp.lt.u32.totalorder %s885_s19, %s1094_s2 }
  0x27   :  { %p891_p4 = pnand %p889_p3, %p886_p2 }
  0x29   :  { %894 = shalt.err (!%p891_p4)
}
  0x2a   :  { %s895_s24 = scalar_lea.vmem %s42_s15, 512  ;;  %p900_p6 = scmp.lt.s32.totalorder %s42_s15, %s42_s15 }
  0x2b   :  { %p896_p5 = scmp.ne.s32.totalorder %s42_s15, %s895_s24  ;;  %p901_p7 = scmp.lt.s32.totalorder %s895_s24, %s895_s24 }
  0x2d   :  { %p902_p8 = por %p901_p7, %p900_p6 }
  0x2f   :  { %p903_p9 = pnand %p902_p8, %p896_p5 }
  0x31   :  { %906 = shalt.err (!%p903_p9)
}
  0x32   :  { %47 = dma.hbm_to_vmem [thread:$0]  %s1094_s2, 512, %s42_s15, [#allocation6], %s937_s27, %s937_s27, %s938_s28  }
  0x33   :  { %929 = dma.done.wait [#allocation3], 512  }
  0x34   :  { %930 = vsyncadd [#allocation3], 4294966784 }
  0x35   :  { %931 = dma.done.wait [#allocation6], 1024  }
  0x36   :  { %932 = vsyncadd [#allocation6], 4294966272  ;;  %v940_v0 = vmov 0.0   ;;  %vm941_vm0 = vmmov 0   ;;  %v69_v1 = vld [vmem:[#allocation5] sm:$0xff]  ;;  %vm73_vm1 = vcmask 64512  }
  0x37   :  { %776 = vmatprep.subr.mxu0 %v940_v0  ;;  %778 = vmatprep.mubr.msk.f32.mxu0 %vm941_vm0, %v940_v0  ;;  %v61_v2 = vld [vmem:[#allocation2] sm:$0xff]  ;;  %v71_v3 = vld [vmem:[#allocation5 + $0x10] sm:$0xff]  ;;  %v70_v5 = vld [vmem:[#allocation5 + $0x8] sm:$0xff]  ;;  %v942_v17 = vmov 0  }
  0x38   :  { %781 = vmatprep.subr.mxu1 %v940_v0  ;;  %783 = vmatprep.mubr.msk.f32.mxu1 %vm941_vm0, %v940_v0  ;;  %v65_v4 = vmul.f32 0.35355338, %v61_v2  ;;  %v62_v6 = vld [vmem:[#allocation2 + $0x8] sm:$0xff]  ;;  %v63_v7 = vld [vmem:[#allocation2 + $0x10] sm:$0xff]  ;;  %v72_v9 = vld [vmem:[#allocation5 + $0x18] sm:$0xff] }
  0x39   :  { %777 = vmatpush3.msra.mxu0 %v69_v1  ;;  %782 = vmatpush3.msra.mxu1 %v70_v5  ;;  %v66_v8 = vmul.f32 0.35355338, %v62_v6  ;;  %v64_v10 = vld [vmem:[#allocation2 + $0x18] sm:$0xff]  ;;  %v67_v11 = vmul.f32 0.35355338, %v63_v7  ;;  %v426_v42 = vld [vmem:[#allocation7] sm:$0xff] }
  0x3a   :  { %786 = vmatprep.subr.mxu0 %v940_v0  ;;  %779 = vmatmul.mubr.msk.f32.vlgmr.msra.gmra.mrb[0].mxu0 %vm73_vm1, %v65_v4  ;;  %v68_v12 = vmul.f32 0.35355338, %v64_v10  ;;  %v366_v13 = vld [vmem:[%s1095_s3] sm:$0x3]  ;;  %v367_v14 = vld [vmem:[%s1095_s3 + $0x2] sm:$0x3] }
  0x3b   :  { %791 = vmatprep.subr.mxu1 %v940_v0  ;;  %787 = vmatpush3.msra.mxu0 %v71_v3  ;;  %vm370_vm2 = vnez %v366_v13  ;;  %vm371_vm3 = vnez %v367_v14  ;;  %v368_v15 = vld [vmem:[%s1095_s3 + $0x4] sm:$0x3]  ;;  %v369_v16 = vld [vmem:[%s1095_s3 + $0x6] sm:$0x3]  ;;  %v427_v43 = vld [vmem:[#allocation7 + $0x8] sm:$0xff]  ;;  %s943_s3 = smov [#allocation8]  }
  0x3c   :  { %784 = vmatmul.mubr.msk.f32.vlgmr.msra.gmra.mrb[0].mxu1 %vm73_vm1, %v66_v8  ;;  %788 = vmatprep.mubr.msk.f32.mxu0 %vm941_vm0, %v940_v0  ;;  %v374_v18 = vsel %vm370_vm2, 16843009, %v942_v17  ;;  %v375_v19 = vsel %vm371_vm3, 16843009, %v942_v17  ;;  %vm372_vm4 = vnez %v368_v15  ;;  %vm373_vm5 = vnez %v369_v16  ;;  %v428_v56 = vld [vmem:[#allocation7 + $0x10] sm:$0xff]  ;;  %v429_v59 = vld [vmem:[#allocation7 + $0x18] sm:$0xff] }
  0x3d   :  { %792 = vmatpush3.msra.mxu1 %v72_v9  ;;  %793 = vmatprep.mubr.msk.f32.mxu1 %vm941_vm0, %v940_v0  ;;  %v378_v20 = vunpack.c.0.s8 %v374_v18  ;;  %v379_v21 = vunpack.c.0.s8 %v375_v19  ;;  %v376_v22 = vsel %vm372_vm4, 16843009, %v942_v17  ;;  %v377_v23 = vsel %vm373_vm5, 16843009, %v942_v17  ;;  %s739_s8 = sshll.u32 %s943_s3, 4  ;;  %s740_s8 = int_to_ptr.vmem [resolvable:$true] %s739_s8 }
  0x3e   :  { %796 = vmatprep.subr.mxu0 %v940_v0  ;;  %789 = vmatmul.mubr.msk.f32.vlgmr.msra.gmra.mrb[2].mxu0 %vm73_vm1, %v67_v11  ;;  %v380_v24 = vunpack.c.0.s8 %v376_v22  ;;  %v381_v25 = vunpack.c.0.s8 %v377_v23  ;;  %s907_s9 = scalar_lea.vmem %s740_s8, 512  ;;  %p912_p11 = scmp.lt.s32.totalorder %s740_s8, %s740_s8 }
  0x3f   :  { %801 = vmatprep.subr.mxu1 %v940_v0  ;;  %798 = vmatprep.mubr.msk.f32.mxu0 %vm941_vm0, %v940_v0  ;;  %vm382_vm6 = vcmp.ne.s32.totalorder %v378_v20, 0  ;;  %vm383_vm7 = vcmp.ne.s32.totalorder %v379_v21, 0  ;;  %p908_p10 = scmp.ne.s32.totalorder %s740_s8, %s907_s9  ;;  %p913_p12 = scmp.lt.s32.totalorder %s907_s9, %s907_s9 }
  0x40   :  { %794 = vmatmul.mubr.msk.f32.vlgmr.msra.gmra.mrb[2].mxu1 %vm73_vm1, %v68_v12  ;;  %vm384_vm8 = vcmp.ne.s32.totalorder %v380_v24, 0  ;;  %vm385_vm9 = vcmp.ne.s32.totalorder %v381_v25, 0  ;;  %797 = vmatpush3.msra.mxu0 %v426_v42 }
  0x41   :  { %803 = vmatprep.mubr.msk.f32.mxu1 %vm941_vm0, %v940_v0  ;;  %806 = vmatprep.subr.mxu0 %v940_v0  ;;  %p914_p13 = por %p913_p12, %p912_p11 }
  0x42   :  { %802 = vmatpush3.msra.mxu1 %v427_v43 }
  0x43   :  { %811 = vmatprep.subr.mxu1 %v940_v0  ;;  %p915_p0 = pnand %p914_p13, %p908_p10 }
 0x10d   :  { %v143_v26 = vpop.f32.mrb[0].mxu0 }
 0x10e   :  { %v386_v27 = vsel %vm382_vm6, -1e-09, %v143_v26  ;;  %v780_v28 = vpop.f32.mrb[1].mxu0 }
 0x10f   :  { %v216_v29 = vpop.f32.mrb[0].mxu1  ;;  %v390_v31 = vsel %vm73_vm1, %v386_v27, -inf }
 0x110   :  { %v387_v30 = vsel %vm383_vm7, -1e-09, %v216_v29  ;;  %v785_v32 = vpop.f32.mrb[1].mxu1  ;;  %391 = vmax.xlane.f32.xlu0 %v390_v31 }
 0x111   :  { %v289_v33 = vpop.f32.mrb[2].mxu0  ;;  %v393_v34 = vsel %vm73_vm1, %v387_v30, -inf }
 0x112   :  { %v388_v35 = vsel %vm384_vm8, -1e-09, %v289_v33  ;;  %v790_v36 = vpop.f32.mrb[3].mxu0 }
 0x113   :  { %v362_v37 = vpop.f32.mrb[2].mxu1  ;;  %v396_v39 = vsel %vm73_vm1, %v388_v35, -inf }
 0x114   :  { %v389_v38 = vsel %vm385_vm9, -1e-09, %v362_v37  ;;  %v795_v40 = vpop.f32.mrb[3].mxu1  ;;  %394 = vmax.xlane.f32.xlu0 %v393_v34  ;;  %397 = vmax.xlane.f32.xlu1 %v396_v39 }
 0x115   :  { %v399_v41 = vsel %vm73_vm1, %v389_v38, -inf }
 0x118   :  { %400 = vmax.xlane.f32.xlu1 %v399_v41 }
 0x19d   :  { %v392_v44 = vpop.xlane.xlu0 %391 }
 0x19e   :  { %v402_v45 = vsub.f32 %v386_v27, %v392_v44 }
 0x1a0   :  { %v406_v46 = vmul.f32 1.442695, %v402_v45 }
 0x1a1   :  { %v395_v47 = vpop.xlane.xlu0 %394  ;;  %v398_v48 = vpop.xlane.xlu1 %397 }
 0x1a2   :  { %825 = vpow2.f32 %v406_v46  ;;  %v403_v49 = vsub.f32 %v387_v30, %v395_v47  ;;  %v404_v50 = vsub.f32 %v388_v35, %v398_v48 }
 0x1a4   :  { %v408_v51 = vmul.f32 1.442695, %v403_v49  ;;  %v410_v52 = vmul.f32 1.442695, %v404_v50 }
 0x1a5   :  { %v401_v53 = vpop.xlane.xlu1 %400 }
 0x1a6   :  { %827 = vpow2.f32 %v408_v51  ;;  %v405_v54 = vsub.f32 %v389_v38, %v401_v53 }
 0x1a7   :  { %829 = vpow2.f32 %v410_v52 }
 0x1a8   :  { %v412_v55 = vmul.f32 1.442695, %v405_v54 }
 0x1aa   :  { %831 = vpow2.f32 %v412_v55 }
 0x1ac   :  { %v826_v57 = vpop.eup %825 }
 0x1ad   :  { %799 = vmatmul.mubr.msk.f32.vlgmr.msra.gmra.mrb[4].mxu0 %vm73_vm1, %v826_v57  ;;  %v414_v58 = vsel %vm73_vm1, %v826_v57, 0.0 }
 0x1ae   :  { %415 = vadd.xlane.f32.xlu0 %v414_v58  ;;  %807 = vmatpush3.msra.mxu0 %v428_v56 }
 0x1af   :  { %808 = vmatprep.mubr.msk.f32.mxu0 %vm941_vm0, %v940_v0 }
 0x1b0   :  { %v828_v60 = vpop.eup %827 }
 0x1b1   :  { %v830_v61 = vpop.eup %829  ;;  %804 = vmatmul.mubr.msk.f32.vlgmr.msra.gmra.mrb[4].mxu1 %vm73_vm1, %v828_v60  ;;  %v417_v62 = vsel %vm73_vm1, %v828_v60, 0.0 }
 0x1b2   :  { %809 = vmatmul.mubr.msk.f32.vlgmr.msra.gmra.mrb[6].mxu0 %vm73_vm1, %v830_v61  ;;  %812 = vmatpush3.msra.mxu1 %v429_v59  ;;  %v420_v63 = vsel %vm73_vm1, %v830_v61, 0.0 }
 0x1b3   :  { %418 = vadd.xlane.f32.xlu1 %v417_v62  ;;  %421 = vadd.xlane.f32.xlu0 %v420_v63 }
 0x1b4   :  { %v832_v1 = vpop.eup %831  ;;  %813 = vmatprep.mubr.msk.f32.mxu1 %vm941_vm0, %v940_v0 }
 0x1b5   :  { %814 = vmatmul.mubr.msk.f32.vlgmr.msra.gmra.mrb[6].mxu1 %vm73_vm1, %v832_v1  ;;  %v423_v2 = vsel %vm73_vm1, %v832_v1, 0.0 }
 0x1b7   :  { %424 = vadd.xlane.f32.xlu1 %v423_v2 }
 0x23b   :  { %v416_v3 = vpop.xlane.xlu0 %415 }
 0x23c   :  { %833 = vrcp.f32 %v416_v3 }
 0x240   :  { %v419_v4 = vpop.xlane.xlu1 %418  ;;  %v422_v5 = vpop.xlane.xlu0 %421 }
 0x241   :  { %835 = vrcp.f32 %v419_v4 }
 0x242   :  { %837 = vrcp.f32 %v422_v5 }
 0x244   :  { %v425_v6 = vpop.xlane.xlu1 %424 }
 0x245   :  { %839 = vrcp.f32 %v425_v6 }
 0x246   :  { %v834_v7 = vpop.eup %833 }
 0x24b   :  { %v836_v0 = vpop.eup %835 }
 0x24c   :  { %v838_v12 = vpop.eup %837 }
 0x24f   :  { %v840_v18 = vpop.eup %839 }
 0x280   :  { %v499_v8 = vpop.f32.mrb[4].mxu0 }
 0x281   :  { %v726_v9 = vmul.f32 %v834_v7, %v499_v8  ;;  %v800_v10 = vpop.f32.mrb[5].mxu0 }
 0x283   :  { %730 = vst.msk [vmem:[#allocation8] sm:$0xff] %vm73_vm1, %v726_v9 }
 0x284   :  { %v572_v11 = vpop.f32.mrb[4].mxu1 }
 0x285   :  { %v727_v13 = vmul.f32 %v836_v0, %v572_v11  ;;  %v645_v14 = vpop.f32.mrb[6].mxu0  ;;  %v805_v15 = vpop.f32.mrb[5].mxu1 }
 0x286   :  { %v728_v16 = vmul.f32 %v838_v12, %v645_v14  ;;  %v810_v17 = vpop.f32.mrb[7].mxu0 }
 0x287   :  { %731 = vst.msk [vmem:[#allocation8 + $0x8] sm:$0xff] %vm73_vm1, %v727_v13 }
 0x288   :  { %732 = vst.msk [vmem:[#allocation8 + $0x10] sm:$0xff] %vm73_vm1, %v728_v16  ;;  %v718_v19 = vpop.f32.mrb[6].mxu1 }
 0x289   :  { %v729_v20 = vmul.f32 %v840_v18, %v718_v19  ;;  %v815_v21 = vpop.f32.mrb[7].mxu1 }
 0x28b   :  { %733 = vst.msk [vmem:[#allocation8 + $0x18] sm:$0xff] %vm73_vm1, %v729_v20 }
 0x28c   :  { %918 = shalt.err (!%p915_p0)
}
 0x28d   :  { %s919_s12 = scalar_lea.hbm %s1096_s4, 512 }
 0x28e   :  { %p920_p1 = scmp.ne.s32.totalorder %s1096_s4, %s919_s12  ;;  %p923_p2 = scmp.lt.u32.totalorder %s919_s12, %s1096_s4 }
 0x290   :  { %p925_p3 = pnand %p923_p2, %p920_p1 }
 0x292   :  { %928 = shalt.err (!%p925_p3)
}
 0x293   :  { %745 = dma.vmem_to_hbm [thread:$0]  %s740_s8, 512, %s1096_s4, [#allocation4], %s937_s27, %s937_s27, %s938_s28  }
 0x294   :  { %933 = dma.done.wait [#allocation4], 512  }
 0x295   :  { %934 = vsyncadd [#allocation4], 4294966784 }
 0x296   :  { %749 = vsyncpa [#allocation3], 1 }
 0x297   :  { %750 = vsyncpa [#allocation6], 1 }
 0x298   :  { %751 = vsyncpa [#allocation4], 1 }

</bundles_post_ra>
